<compile_context>
chip_gen: v7x
topology: tpu7x:2x2x1
jax: 0.10.0
libtpu: 0.0.40
codegen_flags: <defaults>
</compile_context>

<pallas_src>
import functools

import jax
import jax.numpy as jnp
from jax.experimental import pallas as pl
from jax.experimental.pallas import tpu as pltpu


def _embed_distance_matrix(D):
    # Classical-MDS embedding: pairwise squared Euclidean distances between the
    # returned rows reproduce D**2 (for the default 0/1 distance matrix
    # D**2 == D), matching the reference module's embedding.
    n = D.shape[0]
    J = jnp.eye(n, dtype=D.dtype) - 1.0 / n
    B = -0.5 * J @ (D * D) @ J
    w, v = jnp.linalg.eigh(B)
    w = jnp.clip(w, 0.0, None)
    return (v * jnp.sqrt(w)[None, :]).astype(jnp.float32)


def _mggp_rbf_kernel(params_ref, xa_ref, zt_ref, vx_ref, oz_ref, o_ref):
    # params_ref (SMEM scalar prefetch): [c0, c1]
    c0 = params_ref[0]
    c1 = params_ref[1]

    # Pairwise squared distances in ONE augmented MXU dot:
    #   [-2X, x2, 1] @ [Z^T; 1; z2]  ->  x2 + z2 - 2 x.z
    sqdist = jnp.maximum(
        jnp.dot(xa_ref[...], zt_ref[...], preferred_element_type=jnp.float32),
        0.0)                                                   # (TN, TM)

    # w = (0.5/l^2) * val, reconstructed from the (G,G) table via one tiny
    # MXU dot: gathered scaled rows for X  x  one-hot(groupsZ)^T.
    w = jnp.dot(vx_ref[...], oz_ref[...],
                preferred_element_type=jnp.float32)            # (TN, TM)

    # Single fused exponent: log -> EUP, exp -> EUP, 4 VALU ops in between.
    expo = c1 * jnp.log(w) - w * sqdist + c0
    o_ref[...] = jnp.exp(expo).astype(o_ref.dtype)


def _fit_tile(t, full, align):
    t = min(t, full)
    if t == full:
        return t                      # full-extent block is always legal
    t = (t // align) * align
    if t < align:
        return full                   # array smaller than one aligned tile
    return t


def _is_multi_tc_chip():
    # Only v7x has 2 TensorCores per chip; the megacore split is pure per-step
    # overhead on single-TC generations (v5e/v6e).
    try:
        kind = str(jax.devices()[0].device_kind).lower()
    except Exception:
        return False
    return "v7" in kind


def batched_mggp_rbf(X, Z, groupsX, groupsZ, sigma, lengthscale,
                     group_diff_param, embedding, *, diag=False,
                     tn=256, tm=2048, out_dtype=jnp.float32,
                     compute_dtype=jnp.float32):
    if diag:
        # torch: (sigma**2).reshape(-1,1).expand(1, *X.shape)
        return jnp.broadcast_to(jnp.asarray(sigma, jnp.float32) ** 2,
                                (1,) + X.shape)

    N, P = X.shape
    M, _ = Z.shape
    G = embedding.shape[0]
    Pa = P + 2

    # --- wrapper glue: augmented features (norms + (-2) folded into the dot) ---
    Xf = X.astype(jnp.float32)
    Zf = Z.astype(jnp.float32)
    x2 = jnp.sum(Xf * Xf, axis=-1, keepdims=True)              # (N, 1)
    z2 = jnp.sum(Zf * Zf, axis=-1, keepdims=True)              # (M, 1)
    ones_n = jnp.ones((N, 1), jnp.float32)
    ones_m = jnp.ones((M, 1), jnp.float32)
    # NOTE: if compute_dtype=bf16 the norm columns lose precision (documented
    # trade-off); default is f32.
    X_aug = jnp.concatenate([-2.0 * Xf, x2, ones_n],
                            axis=1).astype(compute_dtype)       # (N, P+2)
    Z_augT = jnp.concatenate([Zf, ones_m, z2],
                             axis=1).T.astype(compute_dtype)    # (P+2, M)

    # --- wrapper glue: (G,G) group table, pre-scaled by 0.5/l^2 ---
    emb = embedding.astype(jnp.float32)
    gdiff = emb[:, None, :] - emb[None, :, :]
    gdist = jnp.sum(gdiff * gdiff, axis=-1)                     # (G, G)
    gdp = jnp.abs(jnp.asarray(group_diff_param, jnp.float32))
    val_tab = 1.0 / (gdp * gdist + 1.0)                         # (G, G)

    sigma_f = jnp.asarray(sigma, jnp.float32)
    l_f = jnp.asarray(lengthscale, jnp.float32)
    s = 0.5 / (l_f * l_f)                                       # 0.5 / l^2
    c1 = jnp.float32(0.5 * P)
    c0 = jnp.log(sigma_f * sigma_f) - c1 * jnp.log(s)
    params = jnp.stack([c0, c1]).astype(jnp.float32)

    vx = (s * val_tab)[groupsX]                                 # (N, G) scaled rows
    ohzT = jax.nn.one_hot(groupsZ, G, dtype=jnp.float32).T      # (G, M)

    # --- tiling ---
    row_align = 8 if jnp.dtype(compute_dtype).itemsize >= 4 else 16
    tn = _fit_tile(tn, N, row_align)
    tm = _fit_tile(tm, M, 128)
    # v7x megacore: keep >= 2 grid steps on a parallel axis; prefer splitting
    # along M so output stores stay lane-dense.
    if _is_multi_tc_chip() and pl.cdiv(N, tn) * pl.cdiv(M, tm) < 2:
        if M >= 256:
            tm = _fit_tile(max(128, pl.cdiv(M, 2)), M, 128)
        elif N >= 2 * row_align:
            tn = _fit_tile(max(row_align, pl.cdiv(N, 2)), N, row_align)

    grid = (pl.cdiv(N, tn), pl.cdiv(M, tm))

    out_bytes = jnp.dtype(out_dtype).itemsize
    in_bytes = jnp.dtype(compute_dtype).itemsize
    cost = pl.CostEstimate(
        flops=int(2 * N * M * (Pa + G) + 5 * N * M),
        transcendentals=int(2 * N * M),
        bytes_accessed=int(in_bytes * (N + M) * Pa
                           + 4 * (N + M) * G
                           + out_bytes * N * M),
    )

    return pl.pallas_call(
        _mggp_rbf_kernel,
        out_shape=jax.ShapeDtypeStruct((N, M), out_dtype),
        grid_spec=pltpu.PrefetchScalarGridSpec(
            num_scalar_prefetch=1,
            grid=grid,
            in_specs=[
                pl.BlockSpec((tn, Pa), lambda i, j, prm: (i, 0)),   # X_aug
                pl.BlockSpec((Pa, tm), lambda i, j, prm: (0, j)),   # Z_aug^T
                pl.BlockSpec((tn, G), lambda i, j, prm: (i, 0)),    # scaled val rows
                pl.BlockSpec((G, tm), lambda i, j, prm: (0, j)),    # one-hot(Z)^T
            ],
            out_specs=pl.BlockSpec((tn, tm), lambda i, j, prm: (i, j)),
        ),
        compiler_params=pltpu.CompilerParams(
            dimension_semantics=("parallel", "parallel"),
            vmem_limit_bytes=48 << 20),
        cost_estimate=cost,
    )(params, X_aug, Z_augT, vx, ohzT)


if __name__ == "__main__":
    key = jax.random.PRNGKey(0)
    N, M, P, n_groups = 128, 256, 16, 10
    kx, kz, kgx, kgz = jax.random.split(key, 4)
    X = jax.random.normal(kx, (N, P), jnp.float32)
    Z = jax.random.normal(kz, (M, P), jnp.float32)
    groupsX = jax.random.randint(kgx, (N,), 0, n_groups)
    groupsZ = jax.random.randint(kgz, (M,), 0, n_groups)

    # Deterministic module parameters (matching __init__ defaults).
    sigma = jnp.float32(1.0)
    lengthscale = jnp.float32(1.0)
    group_diff_param = jnp.float32(1.0)
    group_distances = (jnp.ones((n_groups, n_groups), jnp.float32)
                       - jnp.eye(n_groups, dtype=jnp.float32))
    embedding = _embed_distance_matrix(group_distances)

    run = jax.jit(functools.partial(batched_mggp_rbf,
                                    sigma=sigma, lengthscale=lengthscale,
                                    group_diff_param=group_diff_param,
                                    embedding=embedding))
    K = jax.block_until_ready(run(X, Z, groupsX, groupsZ))

    # Pure-JAX reference with exact torch semantics (explicit diff**2 sum, pow).
    def ref(Xa, Za, gXe, gZe):
        diff = Xa[:, None, :] - Za[None, :, :]
        dist = jnp.sum(diff * diff, axis=-1)
        gdiff = gXe[:, None, :] - gZe[None, :, :]
        gdist = jnp.sum(gdiff * gdiff, axis=-1)
        val = 1.0 / (jnp.abs(group_diff_param) * gdist + 1.0)
        return (sigma ** 2 * jnp.exp(-0.5 * dist / lengthscale ** 2 * val)
                * val ** (0.5 * P))

    K_ref = ref(X, Z, embedding[groupsX], embedding[groupsZ])
    assert K.shape == (N, M), K.shape
    err = float(jnp.max(jnp.abs(K - K_ref)))
    assert err < 1e-3, f"max abs err {err}"
    print("KERNEL_OK")
</pallas_src>

<mosaic_0001>
module attributes {stable_mosaic.version = 11 : i64} {
  func.func @_mggp_rbf_kernel(%arg0: i32, %arg1: i32, %arg2: memref<2xf32, #tpu.memory_space<smem>>, %arg3: memref<128x18xf32, #tpu.memory_space<vmem>>, %arg4: memref<18x256xf32, #tpu.memory_space<vmem>>, %arg5: memref<128x10xf32, #tpu.memory_space<vmem>>, %arg6: memref<10x256xf32, #tpu.memory_space<vmem>>, %arg7: memref<128x256xf32, #tpu.memory_space<vmem>>) attributes {dimension_semantics = [#tpu.dimension_semantics<parallel>, #tpu.dimension_semantics<parallel>], iteration_bounds = array<i64: 1, 1>, scalar_prefetch = 1 : i64, scratch_operands = 0 : i64, tpu.core_type = #tpu.core_type<tc>, window_params = [{transform_indices = @transform_0, window_bounds = array<i64: 128, 18>}, {transform_indices = @transform_1, window_bounds = array<i64: 18, 256>}, {transform_indices = @transform_2, window_bounds = array<i64: 128, 10>}, {transform_indices = @transform_3, window_bounds = array<i64: 10, 256>}, {transform_indices = @transform_4, window_bounds = array<i64: 128, 256>}]} {
    %c0 = arith.constant 0 : index
    %0 = memref.load %arg2[%c0] : memref<2xf32, #tpu.memory_space<smem>>
    %c1 = arith.constant 1 : index
    %1 = memref.load %arg2[%c1] : memref<2xf32, #tpu.memory_space<smem>>
    %c0_0 = arith.constant 0 : index
    %c0_1 = arith.constant 0 : index
    %2 = vector.load %arg3[%c0_0, %c0_1] : memref<128x18xf32, #tpu.memory_space<vmem>>, vector<128x18xf32>
    %c0_2 = arith.constant 0 : index
    %c0_3 = arith.constant 0 : index
    %3 = vector.load %arg4[%c0_2, %c0_3] : memref<18x256xf32, #tpu.memory_space<vmem>>, vector<18x256xf32>
    %cst = arith.constant dense<0.000000e+00> : vector<128x256xf32>
    %4 = tpu.matmul %2, %3, %cst {dimension_numbers = #tpu.dot_dimension_numbers<[1], [0], [0], [1], [0, 0, 1, 1], [], []>} : vector<128x18xf32>, vector<18x256xf32>, vector<128x256xf32> -> vector<128x256xf32>
    %cst_4 = arith.constant 0.000000e+00 : f32
    %5 = vector.broadcast %cst_4 : f32 to vector<128x256xf32>
    %6 = arith.maximumf %4, %5 : vector<128x256xf32>
    %c0_5 = arith.constant 0 : index
    %c0_6 = arith.constant 0 : index
    %7 = vector.load %arg5[%c0_5, %c0_6] : memref<128x10xf32, #tpu.memory_space<vmem>>, vector<128x10xf32>
    %c0_7 = arith.constant 0 : index
    %c0_8 = arith.constant 0 : index
    %8 = vector.load %arg6[%c0_7, %c0_8] : memref<10x256xf32, #tpu.memory_space<vmem>>, vector<10x256xf32>
    %cst_9 = arith.constant dense<0.000000e+00> : vector<128x256xf32>
    %9 = tpu.matmul %7, %8, %cst_9 {dimension_numbers = #tpu.dot_dimension_numbers<[1], [0], [0], [1], [0, 0, 1, 1], [], []>} : vector<128x10xf32>, vector<10x256xf32>, vector<128x256xf32> -> vector<128x256xf32>
    %10 = math.log %9 : vector<128x256xf32>
    %11 = vector.broadcast %1 : f32 to vector<128x256xf32>
    %12 = arith.mulf %11, %10 : vector<128x256xf32>
    %13 = arith.mulf %9, %6 : vector<128x256xf32>
    %14 = arith.subf %12, %13 : vector<128x256xf32>
    %15 = vector.broadcast %0 : f32 to vector<128x256xf32>
    %16 = arith.addf %14, %15 : vector<128x256xf32>
    %17 = math.exp %16 : vector<128x256xf32>
    %c0_10 = arith.constant 0 : index
    %c0_11 = arith.constant 0 : index
    %18 = vector.load %arg7[%c0_10, %c0_11] : memref<128x256xf32, #tpu.memory_space<vmem>>, vector<128x256xf32>
    tpu.vector_store %arg7[%c0_10, %c0_11], %17 {strides = array<i32>} : memref<128x256xf32, #tpu.memory_space<vmem>>, vector<128x256xf32>,
    return
  }
  func.func @transform_0(%arg0: i32, %arg1: i32, %arg2: memref<2xf32, #tpu.memory_space<smem>>) -> (i32, i32) {
    %c0_i32 = arith.constant 0 : i32
    %c0_i32_0 = arith.constant 0 : i32
    return %arg0, %c0_i32 : i32, i32
  }
  func.func @transform_1(%arg0: i32, %arg1: i32, %arg2: memref<2xf32, #tpu.memory_space<smem>>) -> (i32, i32) {
    %c0_i32 = arith.constant 0 : i32
    %c0_i32_0 = arith.constant 0 : i32
    return %c0_i32, %arg1 : i32, i32
  }
  func.func @transform_2(%arg0: i32, %arg1: i32, %arg2: memref<2xf32, #tpu.memory_space<smem>>) -> (i32, i32) {
    %c0_i32 = arith.constant 0 : i32
    %c0_i32_0 = arith.constant 0 : i32
    return %arg0, %c0_i32 : i32, i32
  }
  func.func @transform_3(%arg0: i32, %arg1: i32, %arg2: memref<2xf32, #tpu.memory_space<smem>>) -> (i32, i32) {
    %c0_i32 = arith.constant 0 : i32
    %c0_i32_0 = arith.constant 0 : i32
    return %c0_i32, %arg1 : i32, i32
  }
  func.func @transform_4(%arg0: i32, %arg1: i32, %arg2: memref<2xf32, #tpu.memory_space<smem>>) -> (i32, i32) {
    %c0_i32 = arith.constant 0 : i32
    return %arg0, %arg1 : i32, i32
  }
}

</mosaic_0001>

<bundles_post_ra>
// kernel: batched_mggp_rbf.1
= control target key start
LH: loop header
LB: loop body
LE: loop exit
PB: predicated region body
PF: predicated region fallthrough
CT: control target
= control target key end

     0   :  { %s1477_s0 = inlined_call_operand.vmem [shape: f32[2], index: 0, kind: input, shape index: {}]   ;;  %s1478_s1 = inlined_call_operand.vmem [shape: f32[128,18], index: 1, kind: input, shape index: {}]   ;;  %s1479_s2 = inlined_call_operand.vmem [shape: f32[18,256], index: 2, kind: input, shape index: {}]   ;;  %s1480_s3 = inlined_call_operand.vmem [shape: f32[128,10], index: 3, kind: input, shape index: {}]   ;;  %s1481_s4 = inlined_call_operand.vmem [shape: f32[10,256], index: 4, kind: input, shape index: {}]   ;;  %s1482_s5 = inlined_call_operand.hbm [shape: f32[128,256], index: 5, kind: output, shape index: {}]  }
   0x1   :  { %s10_s20 = sshll.u32 %s1477_s0, 4  ;;  %s11_s20 = int_to_ptr.vmem [resolvable:$true] %s10_s20 }
   0x2   :  { %s1021_s21 = scalar_lea.vmem %s11_s20, 16  ;;  %p1026_p1 = scmp.lt.s32.totalorder %s11_s20, %s11_s20 }
   0x3   :  { %p1022_p0 = scmp.ne.s32.totalorder %s11_s20, %s1021_s21  ;;  %p1027_p2 = scmp.lt.s32.totalorder %s1021_s21, %s1021_s21 }
   0x5   :  { %p1028_p3 = por %p1027_p2, %p1026_p1 }
   0x7   :  { %p1029_p4 = pnand %p1028_p3, %p1022_p0 }
   0x9   :  { %1032 = shalt.err (!%p1029_p4)  }
   0xa   :  { %s1059_s22 = smov [#allocation3]  }
   0xb   :  { %13 = dma.vmem_to_smem %s11_s20, 16, %s1059_s22, [#allocation2] }
   0xc   :  { %1055 = dma.done.wait [#allocation2], 16 }
   0xd   :  { %1056 = vsyncadd [#allocation2], 4294967280 }
   0xe   :  { %15 = sfence }
   0xf   :  { %v44_v0 = vld [vmem:[%s1479_s2 + $0x8] sm:$0xff]  ;;  %v46_v1 = vld [vmem:[%s1479_s2 + $0x18] sm:$0xff]  ;;  %vm98_vm0 = vcmask 1041408   ;;  %vm1060_vm1 = vmmov 1   ;;  %v43_v5 = vld [vmem:[%s1479_s2] sm:$0xff]  ;;  %v1061_v6 = vmov 0.0  }
  0x10   :  { %v315_v2 = vld [vmem:[%s1481_s4 + $0x8] sm:$0xff]  ;;  %v877_v3 = vpack.c.bf16 %v46_v1, %v44_v0  ;;  %v317_v4 = vld [vmem:[%s1481_s4 + $0x18] sm:$0x3]  ;;  %vm882_vm2 = vmpackc.low %vm98_vm0, %vm1060_vm1  ;;  %437 = vmatprep.mubr.f32.mxu1 %v1061_v6  ;;  %169 = vmatprep.mubr.f32.mxu0 %v1061_v6  ;;  %vm318_vm3 = vcmask 80896   ;;  %vm49_vm4 = vcmask 146432  }
  0x11   :  { %v881_v7 = vpack.c.bf16 %v317_v4, %v315_v2  ;;  %v45_v8 = vld [vmem:[%s1479_s2 + $0x10] sm:$0xff]  ;;  %v314_v9 = vld [vmem:[%s1481_s4] sm:$0xff]  ;;  %v48_v13 = vld [vmem:[%s1479_s2 + $0x28] sm:$0x3] }
  0x12   :  { %v316_v10 = vld [vmem:[%s1481_s4 + $0x10] sm:$0x3]  ;;  %878 = vmatprep.subr.bf16.mxu0 %v877_v3  ;;  %v879_v11 = vpack.c.bf16 %v45_v8, %v43_v5  ;;  %v298_v14 = vld [vmem:[%s1480_s3] sm:$0xff]  ;;  %v299_v17 = vld [vmem:[%s1480_s3 + $0x8] sm:$0xff] }
  0x13   :  { %v884_v12 = vpack.c.bf16 %v316_v10, %v314_v9  ;;  %883 = vmatprep.subr.msk.bf16.mxu1 %vm882_vm2, %v881_v7  ;;  %v47_v15 = vld [vmem:[%s1479_s2 + $0x20] sm:$0x3]  ;;  %v28_v18 = vld [vmem:[%s1478_s1 + $0x8] sm:$0xff]  ;;  %v300_v19 = vld [vmem:[%s1480_s3 + $0x10] sm:$0xff] }
  0x14   :  { %880 = vmatpush1.bf16.msra.mxu0 %v879_v11  ;;  %v27_v16 = vld [vmem:[%s1478_s1] sm:$0xff] }
  0x15   :  { %886 = vmatpush1.bf16.msk.msra.mxu1 %vm882_vm2, %v884_v12  ;;  %841 = vmatprep.subr.msk.mxu0 %vm98_vm0, %v48_v13 }
  0x18   :  { %861 = vmatmul.mubr.msk.f32.vlgmr.msra.gmra.mrb[0].mxu1 %vm318_vm3, %v298_v14  ;;  %842 = vmatpush1.msk.msra.mxu0 %vm98_vm0, %v47_v15 }
  0x19   :  { %443 = vmatprep.mubr.f32.mxu1 %v1061_v6  ;;  %843 = vmatmul.mubr.msk.f32.vlgmr.msra.gmra.mrb[0].mxu0 %vm49_vm4, %v27_v16 }
  0x1a   :  { %175 = vmatprep.mubr.f32.mxu0 %v1061_v6 }
  0x1c   :  { %862 = vmatmul.mubr.msk.f32.gmra.mrb[2].mxu1 %vm318_vm3, %v299_v17 }
  0x1d   :  { %449 = vmatprep.mubr.f32.mxu1 %v1061_v6  ;;  %844 = vmatmul.mubr.msk.f32.gmra.mrb[2].mxu0 %vm49_vm4, %v28_v18 }
  0x1e   :  { %16 = vsyncpa [#allocation5], 0  ;;  %181 = vmatprep.mubr.f32.mxu0 %v1061_v6  ;;  %v29_v20 = vld [vmem:[%s1478_s1 + $0x10] sm:$0xff]  ;;  %v301_v21 = vld [vmem:[%s1480_s3 + $0x18] sm:$0xff]  ;;  %s840_s23 = sld [smem:[#allocation3 + $0x1]] }
  0x1f   :  { %v30_v22 = vld [vmem:[%s1478_s1 + $0x18] sm:$0xff]  ;;  %v302_v23 = vld [vmem:[%s1480_s3 + $0x20] sm:$0xff]  ;;  %v303_v25 = vld [vmem:[%s1480_s3 + $0x28] sm:$0xff] }
  0x20   :  { %863 = vmatmul.mubr.msk.f32.gmra.mrb[4].mxu1 %vm318_vm3, %v300_v19  ;;  %v31_v24 = vld [vmem:[%s1478_s1 + $0x20] sm:$0xff]  ;;  %v32_v26 = vld [vmem:[%s1478_s1 + $0x28] sm:$0xff]  ;;  %v304_v27 = vld [vmem:[%s1480_s3 + $0x30] sm:$0xff] }
  0x21   :  { %455 = vmatprep.mubr.f32.mxu1 %v1061_v6  ;;  %845 = vmatmul.mubr.msk.f32.gmra.mrb[4].mxu0 %vm49_vm4, %v29_v20  ;;  %v33_v28 = vld [vmem:[%s1478_s1 + $0x30] sm:$0xff]  ;;  %v305_v29 = vld [vmem:[%s1480_s3 + $0x38] sm:$0xff]  ;;  %v306_v31 = vld [vmem:[%s1480_s3 + $0x40] sm:$0xff] }
  0x22   :  { %187 = vmatprep.mubr.f32.mxu0 %v1061_v6  ;;  %v34_v30 = vld [vmem:[%s1478_s1 + $0x38] sm:$0xff]  ;;  %v35_v32 = vld [vmem:[%s1478_s1 + $0x40] sm:$0xff]  ;;  %v307_v33 = vld [vmem:[%s1480_s3 + $0x48] sm:$0xff] }
  0x23   :  { %v36_v34 = vld [vmem:[%s1478_s1 + $0x48] sm:$0xff]  ;;  %v308_v35 = vld [vmem:[%s1480_s3 + $0x50] sm:$0xff]  ;;  %v309_v37 = vld [vmem:[%s1480_s3 + $0x58] sm:$0xff] }
  0x24   :  { %864 = vmatmul.mubr.msk.f32.gmra.mrb[6].mxu1 %vm318_vm3, %v301_v21  ;;  %v37_v36 = vld [vmem:[%s1478_s1 + $0x50] sm:$0xff]  ;;  %v38_v38 = vld [vmem:[%s1478_s1 + $0x58] sm:$0xff]  ;;  %v310_v39 = vld [vmem:[%s1480_s3 + $0x60] sm:$0xff]  ;;  %v1293_v3 = vstv %s840_s23 }
  0x25   :  { %461 = vmatprep.mubr.f32.mxu1 %v1061_v6  ;;  %846 = vmatmul.mubr.msk.f32.gmra.mrb[6].mxu0 %vm49_vm4, %v30_v22  ;;  %v39_v40 = vld [vmem:[%s1478_s1 + $0x60] sm:$0xff]  ;;  %v311_v41 = vld [vmem:[%s1480_s3 + $0x68] sm:$0xff]  ;;  %v312_v43 = vld [vmem:[%s1480_s3 + $0x70] sm:$0xff] }
  0x26   :  { %193 = vmatprep.mubr.f32.mxu0 %v1061_v6  ;;  %v40_v42 = vld [vmem:[%s1478_s1 + $0x68] sm:$0xff]  ;;  %v41_v44 = vld [vmem:[%s1478_s1 + $0x70] sm:$0xff]  ;;  %v313_v45 = vld [vmem:[%s1480_s3 + $0x78] sm:$0xff]  ;;  %s1062_s3 = smov [#allocation4]  }
  0x27   :  { %v42_v46 = vld [vmem:[%s1478_s1 + $0x78] sm:$0xff]  ;;  %s25_s1 = sld [smem:[#allocation3]]  ;;  %s829_s24 = sshll.u32 %s1062_s3, 4  ;;  %s830_s24 = int_to_ptr.vmem [resolvable:$true] %s829_s24 }
  0x28   :  { %865 = vmatmul.mubr.msk.f32.gmra.mrb[8].mxu1 %vm318_vm3, %v302_v23  ;;  %s1033_s25 = scalar_lea.vmem %s830_s24, 4096  ;;  %p1038_p6 = scmp.lt.s32.totalorder %s830_s24, %s830_s24 }
  0x29   :  { %467 = vmatprep.mubr.f32.mxu1 %v1061_v6  ;;  %847 = vmatmul.mubr.msk.f32.gmra.mrb[8].mxu0 %vm49_vm4, %v31_v24  ;;  %p1034_p5 = scmp.ne.s32.totalorder %s830_s24, %s1033_s25  ;;  %p1039_p7 = scmp.lt.s32.totalorder %s1033_s25, %s1033_s25 }
  0x2a   :  { %199 = vmatprep.mubr.f32.mxu0 %v1061_v6 }
  0x2b   :  { %p1040_p8 = por %p1039_p7, %p1038_p6 }
  0x2c   :  { %866 = vmatmul.mubr.msk.f32.gmra.mrb[10].mxu1 %vm318_vm3, %v303_v25 }
  0x2d   :  { %473 = vmatprep.mubr.f32.mxu1 %v1061_v6  ;;  %848 = vmatmul.mubr.msk.f32.gmra.mrb[10].mxu0 %vm49_vm4, %v32_v26  ;;  %v1300_v17 = vstv %s25_s1  ;;  %p1041_p9 = pnand %p1040_p8, %p1034_p5 }
  0x2e   :  { %205 = vmatprep.mubr.f32.mxu0 %v1061_v6 }
  0x30   :  { %867 = vmatmul.mubr.msk.f32.gmra.mrb[12].mxu1 %vm318_vm3, %v304_v27 }
  0x31   :  { %479 = vmatprep.mubr.f32.mxu1 %v1061_v6  ;;  %849 = vmatmul.mubr.msk.f32.gmra.mrb[12].mxu0 %vm49_vm4, %v33_v28 }
  0x32   :  { %211 = vmatprep.mubr.f32.mxu0 %v1061_v6 }
  0x34   :  { %868 = vmatmul.mubr.msk.f32.gmra.mrb[14].mxu1 %vm318_vm3, %v305_v29 }
  0x35   :  { %485 = vmatprep.mubr.f32.mxu1 %v1061_v6  ;;  %850 = vmatmul.mubr.msk.f32.gmra.mrb[14].mxu0 %vm49_vm4, %v34_v30 }
  0x36   :  { %217 = vmatprep.mubr.f32.mxu0 %v1061_v6 }
  0x38   :  { %869 = vmatmul.mubr.msk.f32.gmra.mrb[16].mxu1 %vm318_vm3, %v306_v31 }
  0x39   :  { %491 = vmatprep.mubr.f32.mxu1 %v1061_v6  ;;  %851 = vmatmul.mubr.msk.f32.gmra.mrb[16].mxu0 %vm49_vm4, %v35_v32 }
  0x3a   :  { %223 = vmatprep.mubr.f32.mxu0 %v1061_v6 }
  0x3c   :  { %870 = vmatmul.mubr.msk.f32.gmra.mrb[18].mxu1 %vm318_vm3, %v307_v33 }
  0x3d   :  { %497 = vmatprep.mubr.f32.mxu1 %v1061_v6  ;;  %852 = vmatmul.mubr.msk.f32.gmra.mrb[18].mxu0 %vm49_vm4, %v36_v34 }
  0x3e   :  { %229 = vmatprep.mubr.f32.mxu0 %v1061_v6 }
  0x40   :  { %871 = vmatmul.mubr.msk.f32.gmra.mrb[20].mxu1 %vm318_vm3, %v308_v35 }
  0x41   :  { %503 = vmatprep.mubr.f32.mxu1 %v1061_v6  ;;  %853 = vmatmul.mubr.msk.f32.gmra.mrb[20].mxu0 %vm49_vm4, %v37_v36 }
  0x42   :  { %235 = vmatprep.mubr.f32.mxu0 %v1061_v6 }
  0x44   :  { %872 = vmatmul.mubr.msk.f32.gmra.mrb[22].mxu1 %vm318_vm3, %v309_v37 }
  0x45   :  { %509 = vmatprep.mubr.f32.mxu1 %v1061_v6  ;;  %854 = vmatmul.mubr.msk.f32.gmra.mrb[22].mxu0 %vm49_vm4, %v38_v38 }
  0x46   :  { %241 = vmatprep.mubr.f32.mxu0 %v1061_v6 }
  0x48   :  { %873 = vmatmul.mubr.msk.f32.gmra.mrb[24].mxu1 %vm318_vm3, %v310_v39 }
  0x49   :  { %515 = vmatprep.mubr.f32.mxu1 %v1061_v6  ;;  %855 = vmatmul.mubr.msk.f32.gmra.mrb[24].mxu0 %vm49_vm4, %v39_v40 }
  0x4a   :  { %247 = vmatprep.mubr.f32.mxu0 %v1061_v6 }
  0x4c   :  { %874 = vmatmul.mubr.msk.f32.gmra.mrb[26].mxu1 %vm318_vm3, %v311_v41 }
  0x4d   :  { %521 = vmatprep.mubr.f32.mxu1 %v1061_v6  ;;  %856 = vmatmul.mubr.msk.f32.gmra.mrb[26].mxu0 %vm49_vm4, %v40_v42 }
  0x4e   :  { %253 = vmatprep.mubr.f32.mxu0 %v1061_v6 }
  0x50   :  { %875 = vmatmul.mubr.msk.f32.gmra.mrb[28].mxu1 %vm318_vm3, %v312_v43 }
  0x51   :  { %527 = vmatprep.mubr.f32.mxu1 %v1061_v6  ;;  %857 = vmatmul.mubr.msk.f32.gmra.mrb[28].mxu0 %vm49_vm4, %v41_v44 }
  0x52   :  { %259 = vmatprep.mubr.f32.mxu0 %v1061_v6 }
  0x54   :  { %876 = vmatmul.mubr.msk.f32.gmra.mrb[30].mxu1 %vm318_vm3, %v313_v45 }
  0x55   :  { %858 = vmatmul.mubr.msk.f32.gmra.mrb[30].mxu0 %vm49_vm4, %v42_v46 }
  0xeb   :  { %v439_v47 = vpop.f32.mrb[0].mxu1 }
  0xec   :  { %893 = vlog2.f32 %v439_v47  ;;  %v441_v48 = vpop.f32.mrb[1].mxu1  ;;  %v171_v49 = vpop.f32.mrb[0].mxu0 }
  0xed   :  { %895 = vlog2.f32 %v441_v48  ;;  %v266_v50 = vmax.f32 %v171_v49, 0.0  ;;  %v173_v51 = vpop.f32.mrb[1].mxu0 }
  0xee   :  { %v267_v52 = vmax.f32 %v173_v51, 0.0 }
  0xef   :  { %v445_v53 = vpop.f32.mrb[2].mxu1  ;;  %v631_v54 = vmul.f32 %v439_v47, %v266_v50 }
  0xf0   :  { %897 = vlog2.f32 %v445_v53  ;;  %v447_v55 = vpop.f32.mrb[3].mxu1  ;;  %v632_v56 = vmul.f32 %v441_v48, %v267_v52  ;;  %v177_v57 = vpop.f32.mrb[2].mxu0 }
  0xf1   :  { %899 = vlog2.f32 %v447_v55  ;;  %v268_v58 = vmax.f32 %v177_v57, 0.0  ;;  %v179_v59 = vpop.f32.mrb[3].mxu0 }
  0xf2   :  { %v269_v60 = vmax.f32 %v179_v59, 0.0 }
  0xf3   :  { %v451_v61 = vpop.f32.mrb[4].mxu1  ;;  %v633_v62 = vmul.f32 %v445_v53, %v268_v58 }
  0xf4   :  { %901 = vlog2.f32 %v451_v61  ;;  %v453_v63 = vpop.f32.mrb[5].mxu1  ;;  %v1291_v0 = vmul.f32 %v447_v55, %v269_v60  ;;  %v183_v1 = vpop.f32.mrb[4].mxu0 }
  0xf5   :  { %903 = vlog2.f32 %v453_v63  ;;  %v270_v4 = vmax.f32 %v183_v1, 0.0  ;;  %v185_v5 = vpop.f32.mrb[5].mxu0 }
  0xf6   :  { %v894_v2 = vpop.eup %893  ;;  %v271_v8 = vmax.f32 %v185_v5, 0.0 }
  0xf7   :  { %v896_v6 = vpop.eup %895  ;;  %v535_v7 = vmul.f32 0.6931472, %v894_v2  ;;  %v457_v9 = vpop.f32.mrb[6].mxu1  ;;  %v1295_v11 = vmul.f32 %v451_v61, %v270_v4 }
  0xf8   :  { %v537_v10 = vmul.f32 0.6931472, %v896_v6  ;;  %905 = vlog2.f32 %v457_v9  ;;  %v459_v12 = vpop.f32.mrb[7].mxu1  ;;  %v1298_v14 = vmul.f32 %v453_v63, %v271_v8  ;;  %v189_v15 = vpop.f32.mrb[6].mxu0 }
  0xf9   :  { %v599_v13 = vmul.f32 %v1293_v3, %v535_v7  ;;  %907 = vlog2.f32 %v459_v12  ;;  %v272_v19 = vmax.f32 %v189_v15, 0.0  ;;  %v191_v20 = vpop.f32.mrb[7].mxu0 }
  0xfa   :  { %v898_v16 = vpop.eup %897  ;;  %v600_v18 = vmul.f32 %v1293_v3, %v537_v10  ;;  %v273_v24 = vmax.f32 %v191_v20, 0.0 }
  0xfb   :  { %v900_v21 = vpop.eup %899  ;;  %v663_v22 = vsub.f32 %v599_v13, %v631_v54  ;;  %v539_v23 = vmul.f32 0.6931472, %v898_v16  ;;  %v463_v25 = vpop.f32.mrb[8].mxu1  ;;  %v1303_v28 = vmul.f32 %v457_v9, %v272_v19 }
  0xfc   :  { %v664_v26 = vsub.f32 %v600_v18, %v632_v56  ;;  %v541_v27 = vmul.f32 0.6931472, %v900_v21  ;;  %909 = vlog2.f32 %v463_v25  ;;  %v465_v29 = vpop.f32.mrb[9].mxu1  ;;  %v1307_v32 = vmul.f32 %v459_v12, %v273_v24  ;;  %v195_v33 = vpop.f32.mrb[8].mxu0 }
  0xfd   :  { %v696_v30 = vadd.f32 %v1300_v17, %v663_v22  ;;  %v601_v31 = vmul.f32 %v1293_v3, %v539_v23  ;;  %911 = vlog2.f32 %v465_v29  ;;  %v274_v37 = vmax.f32 %v195_v33, 0.0  ;;  %v197_v38 = vpop.f32.mrb[9].mxu0 }
  0xfe   :  { %v902_v34 = vpop.eup %901  ;;  %v697_v35 = vadd.f32 %v1300_v17, %v664_v26  ;;  %v602_v36 = vmul.f32 %v1293_v3, %v541_v27  ;;  %v275_v43 = vmax.f32 %v197_v38, 0.0 }
  0xff   :  { %v904_v39 = vpop.eup %903  ;;  %v728_v40 = vmul.f32 1.442695, %v696_v30  ;;  %v665_v41 = vsub.f32 %v601_v31, %v633_v62  ;;  %v543_v42 = vmul.f32 0.6931472, %v902_v34  ;;  %v469_v44 = vpop.f32.mrb[10].mxu1  ;;  %v1312_v48 = vmul.f32 %v463_v25, %v274_v37 }
 0x100   :  { %v730_v45 = vmul.f32 1.442695, %v697_v35  ;;  %v666_v46 = vsub.f32 %v602_v36, %v1291_v0  ;;  %v545_v47 = vmul.f32 0.6931472, %v904_v39  ;;  %v471_v49 = vpop.f32.mrb[11].mxu1  ;;  %v1316_v52 = vmul.f32 %v465_v29, %v275_v43  ;;  %v201_v53 = vpop.f32.mrb[10].mxu0 }
 0x101   :  { %913 = vpow2.f32 %v728_v40  ;;  %v698_v50 = vadd.f32 %v1300_v17, %v665_v41  ;;  %v603_v51 = vmul.f32 %v1293_v3, %v543_v42  ;;  %v276_v57 = vmax.f32 %v201_v53, 0.0  ;;  %v203_v58 = vpop.f32.mrb[11].mxu0 }
 0x102   :  { %v906_v54 = vpop.eup %905  ;;  %915 = vpow2.f32 %v730_v45  ;;  %v699_v55 = vadd.f32 %v1300_v17, %v666_v46  ;;  %v604_v56 = vmul.f32 %v1293_v3, %v545_v47  ;;  %v277_v12 = vmax.f32 %v203_v58, 0.0 }
 0x103   :  { %v908_v59 = vpop.eup %907  ;;  %v732_v60 = vmul.f32 1.442695, %v698_v50  ;;  %v667_v61 = vsub.f32 %v603_v51, %v1295_v11  ;;  %v547_v62 = vmul.f32 0.6931472, %v906_v54  ;;  %917 = vlog2.f32 %v469_v44  ;;  %v475_v63 = vpop.f32.mrb[12].mxu1 }
 0x104   :  { %v734_v0 = vmul.f32 1.442695, %v699_v55  ;;  %v668_v1 = vsub.f32 %v604_v56, %v1298_v14  ;;  %v549_v2 = vmul.f32 0.6931472, %v908_v59  ;;  %919 = vlog2.f32 %v471_v49  ;;  %v477_v4 = vpop.f32.mrb[13].mxu1  ;;  %v207_v8 = vpop.f32.mrb[12].mxu0 }
 0x105   :  { %921 = vpow2.f32 %v732_v60  ;;  %v700_v5 = vadd.f32 %v1300_v17, %v667_v61  ;;  %v605_v6 = vmul.f32 %v1293_v3, %v547_v62  ;;  %v1324_v7 = vmul.f32 %v469_v44, %v276_v57  ;;  %v209_v13 = vpop.f32.mrb[13].mxu0 }
 0x106   :  { %v910_v9 = vpop.eup %909  ;;  %923 = vpow2.f32 %v734_v0  ;;  %v701_v10 = vadd.f32 %v1300_v17, %v668_v1  ;;  %v606_v11 = vmul.f32 %v1293_v3, %v549_v2  ;;  %v1330_v23 = vmul.f32 %v471_v49, %v277_v12 }
 0x107   :  { %v912_v14 = vpop.eup %911  ;;  %v736_v15 = vmul.f32 1.442695, %v700_v5  ;;  %v669_v16 = vsub.f32 %v605_v6, %v1303_v28  ;;  %v551_v18 = vmul.f32 0.6931472, %v910_v9  ;;  %925 = vlog2.f32 %v475_v63  ;;  %v481_v19 = vpop.f32.mrb[14].mxu1 }
 0x108   :  { %v738_v20 = vmul.f32 1.442695, %v701_v10  ;;  %v670_v21 = vsub.f32 %v606_v11, %v1307_v32  ;;  %v553_v22 = vmul.f32 0.6931472, %v912_v14  ;;  %v483_v24 = vpop.f32.mrb[15].mxu1  ;;  %v278_v27 = vmax.f32 %v207_v8, 0.0 }
 0x109   :  { %927 = vpow2.f32 %v736_v15  ;;  %v702_v25 = vadd.f32 %v1300_v17, %v669_v16  ;;  %v607_v26 = vmul.f32 %v1293_v3, %v551_v18  ;;  %v213_v29 = vpop.f32.mrb[14].mxu0  ;;  %v279_v31 = vmax.f32 %v209_v13, 0.0 }
 0x10a   :  { %929 = vpow2.f32 %v738_v20  ;;  %v703_v28 = vadd.f32 %v1300_v17, %v670_v21  ;;  %v608_v30 = vmul.f32 %v1293_v3, %v553_v22  ;;  %v215_v33 = vpop.f32.mrb[15].mxu0  ;;  %v1337_v36 = vmul.f32 %v475_v63, %v278_v27 }
 0x10b   :  { %v914_v34 = vpop.eup %913  ;;  %v740_v32 = vmul.f32 1.442695, %v702_v25  ;;  %v671_v35 = vsub.f32 %v607_v26, %v1312_v48  ;;  %931 = vlog2.f32 %v477_v4  ;;  %v487_v37 = vpop.f32.mrb[16].mxu1  ;;  %v1340_v41 = vmul.f32 %v477_v4, %v279_v31 }
 0x10c   :  { %v916_v38 = vpop.eup %915  ;;  %792 = vst [vmem:[#allocation4] sm:$0xff] %v914_v34  ;;  %v742_v39 = vmul.f32 1.442695, %v703_v28  ;;  %v672_v40 = vsub.f32 %v608_v30, %v1316_v52  ;;  %933 = vlog2.f32 %v481_v19  ;;  %v489_v42 = vpop.f32.mrb[17].mxu1  ;;  %v280_v45 = vmax.f32 %v213_v29, 0.0 }
 0x10d   :  { %v918_v43 = vpop.eup %917  ;;  %793 = vst [vmem:[#allocation4 + $0x8] sm:$0xff] %v916_v38  ;;  %935 = vpow2.f32 %v740_v32  ;;  %v704_v44 = vadd.f32 %v1300_v17, %v671_v35  ;;  %v281_v46 = vmax.f32 %v215_v33, 0.0  ;;  %v219_v47 = vpop.f32.mrb[16].mxu0 }
 0x10e   :  { %v920_v48 = vpop.eup %919  ;;  %937 = vpow2.f32 %v742_v39  ;;  %v705_v49 = vadd.f32 %v1300_v17, %v672_v40  ;;  %v555_v50 = vmul.f32 0.6931472, %v918_v43  ;;  %v282_v51 = vmax.f32 %v219_v47, 0.0  ;;  %v221_v53 = vpop.f32.mrb[17].mxu0 }
 0x10f   :  { %v922_v52 = vpop.eup %921  ;;  %v744_v54 = vmul.f32 1.442695, %v704_v44  ;;  %v557_v55 = vmul.f32 0.6931472, %v920_v48  ;;  %939 = vlog2.f32 %v483_v24  ;;  %v1344_v56 = vmul.f32 %v481_v19, %v280_v45  ;;  %v493_v57 = vpop.f32.mrb[18].mxu1 }
 0x110   :  { %v924_v58 = vpop.eup %923  ;;  %794 = vst [vmem:[#allocation4 + $0x10] sm:$0xff] %v922_v52  ;;  %v746_v59 = vmul.f32 1.442695, %v705_v49  ;;  %v609_v60 = vmul.f32 %v1293_v3, %v555_v50  ;;  %v1347_v61 = vmul.f32 %v483_v24, %v281_v46  ;;  %941 = vlog2.f32 %v487_v37  ;;  %v495_v62 = vpop.f32.mrb[19].mxu1 }
 0x111   :  { %v926_v63 = vpop.eup %925  ;;  %795 = vst [vmem:[#allocation4 + $0x18] sm:$0xff] %v924_v58  ;;  %943 = vpow2.f32 %v744_v54  ;;  %v610_v0 = vmul.f32 %v1293_v3, %v557_v55  ;;  %v1350_v1 = vmul.f32 %v487_v37, %v282_v51  ;;  %v283_v2 = vmax.f32 %v221_v53, 0.0  ;;  %v225_v4 = vpop.f32.mrb[18].mxu0 }
 0x112   :  { %945 = vpow2.f32 %v746_v59  ;;  %v673_v5 = vsub.f32 %v609_v60, %v1324_v7  ;;  %v559_v6 = vmul.f32 0.6931472, %v926_v63  ;;  %v284_v8 = vmax.f32 %v225_v4, 0.0  ;;  %v227_v9 = vpop.f32.mrb[19].mxu0 }
 0x113   :  { %v928_v10 = vpop.eup %927  ;;  %v674_v11 = vsub.f32 %v610_v0, %v1330_v23  ;;  %947 = vlog2.f32 %v489_v42  ;;  %v1354_v12 = vmul.f32 %v489_v42, %v283_v2  ;;  %v285_v13 = vmax.f32 %v227_v9, 0.0  ;;  %v499_v14 = vpop.f32.mrb[20].mxu1 }
 0x114   :  { %v930_v15 = vpop.eup %929  ;;  %796 = vst [vmem:[#allocation4 + $0x20] sm:$0xff] %v928_v10  ;;  %v706_v16 = vadd.f32 %v1300_v17, %v673_v5  ;;  %v611_v18 = vmul.f32 %v1293_v3, %v559_v6  ;;  %949 = vlog2.f32 %v493_v57  ;;  %v1358_v19 = vmul.f32 %v493_v57, %v284_v8  ;;  %v501_v7 = vpop.f32.mrb[21].mxu1 }
 0x115   :  { %v932_v20 = vpop.eup %931  ;;  %797 = vst [vmem:[#allocation4 + $0x28] sm:$0xff] %v930_v15  ;;  %v707_v21 = vadd.f32 %v1300_v17, %v674_v11  ;;  %951 = vlog2.f32 %v495_v62  ;;  %v1361_v22 = vmul.f32 %v495_v62, %v285_v13  ;;  %v231_v23 = vpop.f32.mrb[20].mxu0 }
 0x116   :  { %v934_v24 = vpop.eup %933  ;;  %v748_v25 = vmul.f32 1.442695, %v706_v16  ;;  %v561_v26 = vmul.f32 0.6931472, %v932_v20  ;;  %v675_v27 = vsub.f32 %v611_v18, %v1337_v36  ;;  %953 = vlog2.f32 %v499_v14  ;;  %v233_v29 = vpop.f32.mrb[21].mxu0 }
 0x117   :  { %v936_v28 = vpop.eup %935  ;;  %v750_v30 = vmul.f32 1.442695, %v707_v21  ;;  %v563_v31 = vmul.f32 0.6931472, %v934_v24  ;;  %955 = vlog2.f32 %v501_v7  ;;  %v286_v33 = vmax.f32 %v231_v23, 0.0  ;;  %v505_v34 = vpop.f32.mrb[22].mxu1 }
 0x118   :  { %v938_v32 = vpop.eup %937  ;;  %798 = vst [vmem:[#allocation4 + $0x30] sm:$0xff] %v936_v28  ;;  %957 = vpow2.f32 %v748_v25  ;;  %v708_v35 = vadd.f32 %v1300_v17, %v675_v27  ;;  %v612_v37 = vmul.f32 %v1293_v3, %v561_v26  ;;  %v287_v38 = vmax.f32 %v233_v29, 0.0  ;;  %v507_v39 = vpop.f32.mrb[23].mxu1 }
 0x119   :  { %v940_v40 = vpop.eup %939  ;;  %799 = vst [vmem:[#allocation4 + $0x38] sm:$0xff] %v938_v32  ;;  %959 = vpow2.f32 %v750_v30  ;;  %v613_v36 = vmul.f32 %v1293_v3, %v563_v31  ;;  %v1367_v42 = vmul.f32 %v499_v14, %v286_v33  ;;  %v237_v43 = vpop.f32.mrb[22].mxu0 }
 0x11a   :  { %v942_v44 = vpop.eup %941  ;;  %v752_v45 = vmul.f32 1.442695, %v708_v35  ;;  %v676_v46 = vsub.f32 %v612_v37, %v1340_v41  ;;  %v565_v47 = vmul.f32 0.6931472, %v940_v40  ;;  %v1370_v48 = vmul.f32 %v501_v7, %v287_v38  ;;  %v239_v49 = vpop.f32.mrb[23].mxu0 }
 0x11b   :  { %v944_v50 = vpop.eup %943  ;;  %v677_v51 = vsub.f32 %v613_v36, %v1344_v56  ;;  %v567_v53 = vmul.f32 0.6931472, %v942_v44  ;;  %961 = vlog2.f32 %v505_v34  ;;  %v288_v52 = vmax.f32 %v237_v43, 0.0  ;;  %v1373_v54 = vpop.f32.mrb[24].mxu1 }
 0x11c   :  { %v946_v55 = vpop.eup %945  ;;  %800 = vst [vmem:[#allocation4 + $0x40] sm:$0xff] %v944_v50  ;;  %963 = vpow2.f32 %v752_v45  ;;  %v709_v57 = vadd.f32 %v1300_v17, %v676_v46  ;;  %v614_v58 = vmul.f32 %v1293_v3, %v565_v47  ;;  %v289_v41 = vmax.f32 %v239_v49, 0.0  ;;  %v1377_v59 = vpop.f32.mrb[25].mxu1 }
 0x11d   :  { %v948_v60 = vpop.eup %947  ;;  %801 = vst [vmem:[#allocation4 + $0x48] sm:$0xff] %v946_v55  ;;  %v710_v62 = vadd.f32 %v1300_v17, %v677_v51  ;;  %v615_v56 = vmul.f32 %v1293_v3, %v567_v53  ;;  %965 = vlog2.f32 %v507_v39  ;;  %v1381_v63 = vmul.f32 %v505_v34, %v288_v52  ;;  %v243_v0 = vpop.f32.mrb[24].mxu0 }
 0x11e   :  { %v950_v2 = vpop.eup %949  ;;  %v754_v4 = vmul.f32 1.442695, %v709_v57  ;;  %v678_v5 = vsub.f32 %v614_v58, %v1347_v61  ;;  %v569_v6 = vmul.f32 0.6931472, %v948_v60  ;;  %v1384_v8 = vmul.f32 %v507_v39, %v289_v41  ;;  %v1386_v9 = vpop.f32.mrb[25].mxu0 }
 0x11f   :  { %v952_v10 = vpop.eup %951  ;;  %v756_v11 = vmul.f32 1.442695, %v710_v62  ;;  %v679_v13 = vsub.f32 %v615_v56, %v1350_v1  ;;  %v571_v14 = vmul.f32 0.6931472, %v950_v2  ;;  %967 = vlog2.f32 %v1373_v54  ;;  %v1390_v15 = vpop.f32.mrb[26].mxu1 }
 0x120   :  { %v954_v16 = vpop.eup %953  ;;  %969 = vpow2.f32 %v754_v4  ;;  %v711_v18 = vadd.f32 %v1300_v17, %v678_v5  ;;  %v616_v61 = vmul.f32 %v1293_v3, %v569_v6  ;;  %v573_v7 = vmul.f32 0.6931472, %v952_v10  ;;  %v1394_v20 = vpop.f32.mrb[27].mxu1 }
 0x121   :  { %v956_v21 = vpop.eup %955  ;;  %971 = vpow2.f32 %v756_v11  ;;  %v712_v23 = vadd.f32 %v1300_v17, %v679_v13  ;;  %v617_v1 = vmul.f32 %v1293_v3, %v571_v14  ;;  %v575_v24 = vmul.f32 0.6931472, %v954_v16  ;;  %v1398_v25 = vpop.f32.mrb[26].mxu0 }
 0x122   :  { %v958_v26 = vpop.eup %957  ;;  %v758_v27 = vmul.f32 1.442695, %v711_v18  ;;  %v680_v29 = vsub.f32 %v616_v61, %v1354_v12  ;;  %v618_v28 = vmul.f32 %v1293_v3, %v573_v7  ;;  %v577_v30 = vmul.f32 0.6931472, %v956_v21  ;;  %v1402_v31 = vpop.f32.mrb[27].mxu0 }
 0x123   :  { %v960_v33 = vpop.eup %959  ;;  %802 = vst [vmem:[#allocation4 + $0x50] sm:$0xff] %v958_v26  ;;  %v760_v34 = vmul.f32 1.442695, %v712_v23  ;;  %v681_v32 = vsub.f32 %v617_v1, %v1358_v19  ;;  %v619_v35 = vmul.f32 %v1293_v3, %v575_v24  ;;  %973 = vlog2.f32 %v1377_v59  ;;  %v1407_v37 = vpop.f32.mrb[28].mxu1 }
 0x124   :  { %803 = vst [vmem:[#allocation4 + $0x58] sm:$0xff] %v960_v33  ;;  %975 = vpow2.f32 %v758_v27  ;;  %v713_v12 = vadd.f32 %v1300_v17, %v680_v29  ;;  %v682_v38 = vsub.f32 %v618_v28, %v1361_v22  ;;  %v620_v39 = vmul.f32 %v1293_v3, %v577_v30  ;;  %v1412_v40 = vpop.f32.mrb[29].mxu1  ;;  %v255_v45 = vpop.f32.mrb[28].mxu0 }
 0x125   :  { %v962_v36 = vpop.eup %961  ;;  %977 = vpow2.f32 %v760_v34  ;;  %v714_v19 = vadd.f32 %v1300_v17, %v681_v32  ;;  %v683_v43 = vsub.f32 %v619_v35, %v1367_v42  ;;  %v290_v44 = vmax.f32 %v243_v0, 0.0  ;;  %v257_v22 = vpop.f32.mrb[29].mxu0 }
 0x126   :  { %v964_v46 = vpop.eup %963  ;;  %v762_v47 = vmul.f32 1.442695, %v713_v12  ;;  %v715_v49 = vadd.f32 %v1300_v17, %v682_v38  ;;  %v684_v50 = vsub.f32 %v620_v39, %v1370_v48  ;;  %v579_v51 = vmul.f32 0.6931472, %v962_v36 }
 0x127   :  { %v966_v53 = vpop.eup %965  ;;  %804 = vst [vmem:[#allocation4 + $0x60] sm:$0xff] %v964_v46  ;;  %v764_v52 = vmul.f32 1.442695, %v714_v19  ;;  %v716_v55 = vadd.f32 %v1300_v17, %v683_v43  ;;  %v655_v57 = vmul.f32 %v1373_v54, %v290_v44  ;;  %v291_v58 = vmax.f32 %v1386_v9, 0.0  ;;  %v529_v42 = vpop.f32.mrb[30].mxu1 }
 0x128   :  { %979 = vpow2.f32 %v762_v47  ;;  %v766_v41 = vmul.f32 1.442695, %v715_v49  ;;  %v717_v60 = vadd.f32 %v1300_v17, %v684_v50  ;;  %v581_v62 = vmul.f32 0.6931472, %v966_v53  ;;  %v1422_v56 = vpop.f32.mrb[31].mxu1  ;;  %v261_v5 = vpop.f32.mrb[30].mxu0 }
 0x129   :  { %v968_v48 = vpop.eup %967  ;;  %981 = vpow2.f32 %v764_v52  ;;  %v768_v0 = vmul.f32 1.442695, %v716_v55  ;;  %v621_v2 = vmul.f32 %v1293_v3, %v579_v51  ;;  %v656_v4 = vmul.f32 %v1377_v59, %v291_v58  ;;  %v263_v11 = vpop.f32.mrb[31].mxu0 }
 0x12a   :  { %v970_v6 = vpop.eup %969  ;;  %983 = vpow2.f32 %v766_v41  ;;  %v770_v54 = vmul.f32 1.442695, %v717_v60  ;;  %v622_v9 = vmul.f32 %v1293_v3, %v581_v62  ;;  %v583_v10 = vmul.f32 0.6931472, %v968_v48 }
 0x12b   :  { %v972_v13 = vpop.eup %971  ;;  %805 = vst [vmem:[#allocation4 + $0x68] sm:$0xff] %v970_v6  ;;  %985 = vpow2.f32 %v768_v0  ;;  %v685_v14 = vsub.f32 %v621_v2, %v1381_v63  ;;  %v292_v16 = vmax.f32 %v1398_v25, 0.0  ;;  %v293_v18 = vmax.f32 %v1402_v31, 0.0 }
 0x12c   :  { %806 = vst [vmem:[#allocation4 + $0x70] sm:$0xff] %v972_v13  ;;  %987 = vpow2.f32 %v770_v54  ;;  %v686_v59 = vsub.f32 %v622_v9, %v1384_v8  ;;  %v623_v61 = vmul.f32 %v1293_v3, %v583_v10  ;;  %v294_v7 = vmax.f32 %v255_v45, 0.0 }
 0x12d   :  { %v974_v21 = vpop.eup %973  ;;  %v718_v23 = vadd.f32 %v1300_v17, %v685_v14  ;;  %989 = vlog2.f32 %v1390_v15  ;;  %v1435_v1 = vmul.f32 %v1390_v15, %v292_v16  ;;  %v1438_v63 = vmul.f32 %v1394_v20, %v293_v18 }
 0x12e   :  { %v976_v24 = vpop.eup %975  ;;  %v719_v25 = vadd.f32 %v1300_v17, %v686_v59  ;;  %v585_v26 = vmul.f32 0.6931472, %v974_v21  ;;  %v687_v27 = vsub.f32 %v623_v61, %v655_v57  ;;  %991 = vlog2.f32 %v1394_v20 }
 0x12f   :  { %v978_v8 = vpop.eup %977  ;;  %807 = vst [vmem:[#allocation4 + $0x78] sm:$0xff] %v976_v24  ;;  %v772_v29 = vmul.f32 1.442695, %v718_v23  ;;  %993 = vlog2.f32 %v1407_v37  ;;  %v659_v28 = vmul.f32 %v1407_v37, %v294_v7  ;;  %v295_v30 = vmax.f32 %v257_v22, 0.0 }
 0x130   :  { %808 = vst [vmem:[#allocation4 + $0x80] sm:$0xff] %v978_v8  ;;  %v774_v15 = vmul.f32 1.442695, %v719_v25  ;;  %v720_v31 = vadd.f32 %v1300_v17, %v687_v27  ;;  %v624_v33 = vmul.f32 %v1293_v3, %v585_v26  ;;  %995 = vlog2.f32 %v1412_v40 }
 0x131   :  { %997 = vpow2.f32 %v772_v29  ;;  %v660_v34 = vmul.f32 %v1412_v40, %v295_v30  ;;  %v296_v20 = vmax.f32 %v261_v5, 0.0  ;;  %v297_v32 = vmax.f32 %v263_v11, 0.0 }
 0x132   :  { %v980_v35 = vpop.eup %979  ;;  %999 = vpow2.f32 %v774_v15  ;;  %v776_v12 = vmul.f32 1.442695, %v720_v31  ;;  %v688_v38 = vsub.f32 %v624_v33, %v656_v4 }
 0x133   :  { %v982_v39 = vpop.eup %981  ;;  %809 = vst [vmem:[#allocation4 + $0x88] sm:$0xff] %v980_v35  ;;  %1001 = vlog2.f32 %v529_v42  ;;  %v661_v37 = vmul.f32 %v529_v42, %v296_v20  ;;  %v662_v36 = vmul.f32 %v1422_v56, %v297_v32 }
 0x134   :  { %v984_v19 = vpop.eup %983  ;;  %810 = vst [vmem:[#allocation4 + $0x90] sm:$0xff] %v982_v39  ;;  %1003 = vpow2.f32 %v776_v12  ;;  %v721_v43 = vadd.f32 %v1300_v17, %v688_v38 }
 0x135   :  { %v986_v44 = vpop.eup %985  ;;  %811 = vst [vmem:[#allocation4 + $0x98] sm:$0xff] %v984_v19  ;;  %1005 = vlog2.f32 %v1422_v56 }
 0x136   :  { %v988_v40 = vpop.eup %987  ;;  %812 = vst [vmem:[#allocation4 + $0xa0] sm:$0xff] %v986_v44  ;;  %v778_v45 = vmul.f32 1.442695, %v721_v43 }
 0x137   :  { %v990_v46 = vpop.eup %989  ;;  %813 = vst [vmem:[#allocation4 + $0xa8] sm:$0xff] %v988_v40 }
 0x138   :  { %v992_v47 = vpop.eup %991  ;;  %1007 = vpow2.f32 %v778_v45  ;;  %v587_v49 = vmul.f32 0.6931472, %v990_v46 }
 0x139   :  { %v994_v50 = vpop.eup %993  ;;  %v589_v51 = vmul.f32 0.6931472, %v992_v47 }
 0x13a   :  { %v996_v22 = vpop.eup %995  ;;  %v625_v53 = vmul.f32 %v1293_v3, %v587_v49  ;;  %v591_v52 = vmul.f32 0.6931472, %v994_v50 }
 0x13b   :  { %v998_v55 = vpop.eup %997  ;;  %v626_v57 = vmul.f32 %v1293_v3, %v589_v51  ;;  %v593_v58 = vmul.f32 0.6931472, %v996_v22 }
 0x13c   :  { %v1000_v42 = vpop.eup %999  ;;  %814 = vst [vmem:[#allocation4 + $0xb0] sm:$0xff] %v998_v55  ;;  %v689_v41 = vsub.f32 %v625_v53, %v1435_v1  ;;  %v627_v60 = vmul.f32 %v1293_v3, %v591_v52 }
 0x13d   :  { %v1002_v62 = vpop.eup %1001  ;;  %815 = vst [vmem:[#allocation4 + $0xb8] sm:$0xff] %v1000_v42  ;;  %v690_v56 = vsub.f32 %v626_v57, %v1438_v63  ;;  %v628_v48 = vmul.f32 %v1293_v3, %v593_v58 }
 0x13e   :  { %v1004_v0 = vpop.eup %1003  ;;  %v722_v2 = vadd.f32 %v1300_v17, %v689_v41  ;;  %v691_v4 = vsub.f32 %v627_v60, %v659_v28  ;;  %v595_v5 = vmul.f32 0.6931472, %v1002_v62 }
 0x13f   :  { %v1006_v6 = vpop.eup %1005  ;;  %816 = vst [vmem:[#allocation4 + $0xc0] sm:$0xff] %v1004_v0  ;;  %v723_v54 = vadd.f32 %v1300_v17, %v690_v56  ;;  %v692_v9 = vsub.f32 %v628_v48, %v660_v34 }
 0x140   :  { %v780_v10 = vmul.f32 1.442695, %v722_v2  ;;  %v724_v11 = vadd.f32 %v1300_v17, %v691_v4  ;;  %v597_v13 = vmul.f32 0.6931472, %v1006_v6  ;;  %v629_v14 = vmul.f32 %v1293_v3, %v595_v5 }
 0x141   :  { %v782_v16 = vmul.f32 1.442695, %v723_v54  ;;  %v725_v18 = vadd.f32 %v1300_v17, %v692_v9 }
 0x142   :  { %v1008_v59 = vpop.eup %1007  ;;  %1009 = vpow2.f32 %v780_v10  ;;  %v784_v61 = vmul.f32 1.442695, %v724_v11  ;;  %v630_v7 = vmul.f32 %v1293_v3, %v597_v13  ;;  %v693_v21 = vsub.f32 %v629_v14, %v661_v37 }
 0x143   :  { %817 = vst [vmem:[#allocation4 + $0xc8] sm:$0xff] %v1008_v59  ;;  %1011 = vpow2.f32 %v782_v16  ;;  %v786_v23 = vmul.f32 1.442695, %v725_v18 }
 0x144   :  { %1013 = vpow2.f32 %v784_v61  ;;  %v726_v1 = vadd.f32 %v1300_v17, %v693_v21  ;;  %v694_v63 = vsub.f32 %v630_v7, %v662_v36 }
 0x145   :  { %1015 = vpow2.f32 %v786_v23 }
 0x146   :  { %v788_v24 = vmul.f32 1.442695, %v726_v1  ;;  %v727_v25 = vadd.f32 %v1300_v17, %v694_v63 }
 0x148   :  { %1017 = vpow2.f32 %v788_v24  ;;  %v790_v26 = vmul.f32 1.442695, %v727_v25 }
 0x14a   :  { %1019 = vpow2.f32 %v790_v26 }
 0x14c   :  { %v1010_v27 = vpop.eup %1009 }
 0x14d   :  { %v1012_v8 = vpop.eup %1011  ;;  %818 = vst [vmem:[#allocation4 + $0xd0] sm:$0xff] %v1010_v27 }
 0x14e   :  { %v1014_v29 = vpop.eup %1013  ;;  %819 = vst [vmem:[#allocation4 + $0xd8] sm:$0xff] %v1012_v8 }
 0x14f   :  { %v1016_v3 = vpop.eup %1015  ;;  %820 = vst [vmem:[#allocation4 + $0xe0] sm:$0xff] %v1014_v29 }
 0x150   :  { %821 = vst [vmem:[#allocation4 + $0xe8] sm:$0xff] %v1016_v3 }
 0x152   :  { %v1018_v28 = vpop.eup %1017 }
 0x153   :  { %822 = vst [vmem:[#allocation4 + $0xf0] sm:$0xff] %v1018_v28 }
 0x154   :  { %v1020_v30 = vpop.eup %1019 }
 0x155   :  { %823 = vst [vmem:[#allocation4 + $0xf8] sm:$0xff] %v1020_v30 }
 0x156   :  { %1044 = shalt.err (!%p1041_p9)
}
 0x157   :  { %s1045_s27 = scalar_lea.hbm %s1482_s5, 4096 }
 0x158   :  { %p1046_p10 = scmp.ne.s32.totalorder %s1482_s5, %s1045_s27  ;;  %p1049_p11 = scmp.lt.u32.totalorder %s1045_s27, %s1482_s5 }
 0x15a   :  { %p1051_p12 = pnand %p1049_p11, %p1046_p10 }
 0x15c   :  { %1054 = shalt.err (!%p1051_p12)
}
 0x15d   :  { %s1063_s7 = smov 256   ;;  %s1064_s8 = smov 16  }
 0x15e   :  { %835 = dma.vmem_to_hbm [thread:$0]  %s830_s24, 4096, %s1482_s5, [#allocation5], %s1063_s7, %s1063_s7, %s1064_s8  }
 0x15f   :  { %1057 = dma.done.wait [#allocation5], 4096  }
 0x160   :  { %1058 = vsyncadd [#allocation5], 4294963200 }
 0x161   :  { %839 = vsyncpa [#allocation5], 1 }

</bundles_post_ra>
